<compile_context>
chip_gen: v6e
topology: v6e:2x2x1
jax: 0.10.0
libtpu: 0.0.40
codegen_flags: <defaults>
</compile_context>

<pallas_src>
import functools

import jax
import jax.numpy as jnp
from jax.experimental import pallas as pl
from jax.experimental.pallas import tpu as pltpu


def _vmem_budgets():
    """(vmem_limit_bytes, tile_budget_bytes) per TPU generation."""
    try:
        cap = pltpu.get_tpu_info().vmem_capacity_bytes
    except Exception:
        cap = 64 * 1024 * 1024               # assume the smallest (v7x)
    if cap >= 128 * 1024 * 1024:             # v5e / v6e: plenty of headroom
        return 64 * 1024 * 1024, 28 * 1024 * 1024
    return 40 * 1024 * 1024, 14 * 1024 * 1024   # v7x: 64 MiB physical VMEM


def _pick_block_rows(n_rows, hidden, in_bytes, out_bytes, budget, min_steps=8):
    """Largest row tile (multiple of 8) whose double-buffered in/out tiles PLUS
    the in-kernel f32 working set (x upcast + one live intermediate, ~8 B/elem)
    fit the VMEM budget.  Capped at 512 rows (roofline already ~86% there) and
    so that the grid keeps >= min_steps steps for megacore + pipelining."""
    per_row = hidden * (in_bytes + out_bytes) * 2 + hidden * 8
    target = min(max(8, budget // max(per_row, 1)), 512)
    step_cap = max(8, (pl.cdiv(n_rows, max(min_steps, 1)) // 8) * 8)
    target = min(int(target), step_cap)
    return max(8, (target // 8) * 8)


# ----------------------------- kernel ----------------------------------------

def _normalize(x, norm_mode, eps):
    x = x.astype(jnp.float32)
    if norm_mode == "rmsnorm":
        ms = jnp.mean(x * x, axis=-1, keepdims=True)
        return x * jax.lax.rsqrt(ms + eps)
    # 'normal': single-pass stats, var = E[x^2] - u^2 (clamped), rsqrt on EUP.
    u = jnp.mean(x, axis=-1, keepdims=True)
    ms = jnp.mean(x * x, axis=-1, keepdims=True)
    var = jnp.maximum(ms - u * u, 0.0)
    return (x - u) * jax.lax.rsqrt(var + eps)


def _ln_kernel(x_ref, g_ref, b_ref, o_ref, *, norm_mode, eps):
    # x_ref/o_ref: (block_rows, H); g_ref/b_ref: (1, H) broadcast over rows.
    o = _normalize(x_ref[...], norm_mode, eps)
    o_ref[...] = (g_ref[...] * o + b_ref[...]).astype(o_ref.dtype)


# ----------------------------- pallas_call wrappers ---------------------------

def _ln_call(xf, gamma2d, beta2d, norm_mode, eps, block_rows, vmem_limit):
    """Unconditional path: xf (N, H), gamma/beta (1, H). Edge block is masked
    by Pallas (no pad / slice passes)."""
    N, H = xf.shape
    br = block_rows
    kern = functools.partial(_ln_kernel, norm_mode=norm_mode, eps=eps)
    return pl.pallas_call(
        kern,
        out_shape=jax.ShapeDtypeStruct((N, H), xf.dtype),
        grid_spec=pltpu.PrefetchScalarGridSpec(
            num_scalar_prefetch=0,
            grid=(pl.cdiv(N, br),),
            in_specs=[pl.BlockSpec((br, H), lambda i: (i, 0)),
                      pl.BlockSpec((1, H), lambda i: (0, 0)),
                      pl.BlockSpec((1, H), lambda i: (0, 0))],
            out_specs=pl.BlockSpec((br, H), lambda i: (i, 0)),
        ),
        compiler_params=pltpu.CompilerParams(
            dimension_semantics=("parallel",),
            vmem_limit_bytes=vmem_limit),
    )(xf, gamma2d, beta2d)


def _ln_cond_call(xg, gamma3d, beta3d, norm_mode, eps, block_rows, vmem_limit):
    """Conditional path: xg (G, R, H) grouped per cond row; gamma/beta
    (G, 1, H).  Each row tile lives inside one cond group, so gamma/beta are
    indexed by the group grid axis with a Squeezed leading dim (satisfies the
    (8,128) block rule).  Edge block along R is masked by Pallas."""
    G, R, H = xg.shape
    br = block_rows
    kern = functools.partial(_ln_kernel, norm_mode=norm_mode, eps=eps)
    return pl.pallas_call(
        kern,
        out_shape=jax.ShapeDtypeStruct((G, R, H), xg.dtype),
        grid_spec=pltpu.PrefetchScalarGridSpec(
            num_scalar_prefetch=0,
            grid=(G, pl.cdiv(R, br)),
            in_specs=[pl.BlockSpec((None, br, H), lambda g, j: (g, j, 0)),
                      pl.BlockSpec((None, 1, H), lambda g, j: (g, 0, 0)),
                      pl.BlockSpec((None, 1, H), lambda g, j: (g, 0, 0))],
            out_specs=pl.BlockSpec((None, br, H), lambda g, j: (g, j, 0)),
        ),
        compiler_params=pltpu.CompilerParams(
            dimension_semantics=("parallel", "parallel"),
            vmem_limit_bytes=vmem_limit),
    )(xg, gamma3d, beta3d)


# ----------------------------- public wrapper ---------------------------------

def layer_norm(x, weight, bias, cond=None, dense1_w=None, dense2_w=None,
               *, norm_mode="normal", eps=1e-12, block_rows=None):
    """Pallas LayerNorm. `x` has shape (..., H). `cond` (if given) has shape
    (x_leading_prefix..., C) and is broadcast over the remaining leading dims
    of x (PyTorch unsqueeze semantics)."""
    orig_shape = x.shape
    H = orig_shape[-1]
    # TODO(synk): for production use keep H a multiple of 128 (lane width) or
    # fold rows into lane-dense tiles; small H (H=32 test) forces masked
    # vst.msk partial stores and wastes 3/4 of each vreg.
    elem_bytes = jnp.dtype(x.dtype).itemsize
    vmem_limit, tile_budget = _vmem_budgets()

    if cond is None:
        xf = x.reshape(-1, H)
        N = xf.shape[0]
        br = block_rows or _pick_block_rows(N, H, elem_bytes, elem_bytes,
                                            tile_budget)
        gamma = weight.reshape(1, H).astype(jnp.float32)
        beta = bias.reshape(1, H).astype(jnp.float32)
        out = _ln_call(xf, gamma, beta, norm_mode, eps, br, vmem_limit)
        return out.reshape(orig_shape)

    # Conditional path.
    C = cond.shape[-1]
    assert cond.shape[:-1] == orig_shape[:cond.ndim - 1], \
        "cond leading dims must be a prefix of x leading dims"
    G = 1
    for d in cond.shape[:-1]:
        G *= d
    R = 1
    for d in orig_shape[cond.ndim - 1:-1]:
        R *= d

    # Hoist the gamma/beta projection: one small (G, C) @ (C, H) matmul in XLA
    # instead of redoing it (and re-DMAing the (C, H) weights) every row tile.
    cond2d = cond.reshape(G, C).astype(jnp.float32)
    w1 = dense1_w.astype(jnp.float32)   # PyTorch nn.Linear weight: (H, C)
    w2 = dense2_w.astype(jnp.float32)
    gamma = (weight.astype(jnp.float32)[None, :] + cond2d @ w1.T)  # (G, H)
    beta = (bias.astype(jnp.float32)[None, :] + cond2d @ w2.T)     # (G, H)
    gamma = gamma.reshape(G, 1, H)
    beta = beta.reshape(G, 1, H)

    xg = x.reshape(G, R, H)
    br = block_rows or _pick_block_rows(
        R, H, elem_bytes, elem_bytes, tile_budget,
        min_steps=pl.cdiv(8, max(G, 1)))
    out = _ln_cond_call(xg, gamma, beta, norm_mode, eps, br, vmem_limit)
    return out.reshape(orig_shape)


# ----------------------------- reference -------------------------------------

def layer_norm_ref(x, weight, bias, cond=None, dense1_w=None, dense2_w=None,
                   *, norm_mode="normal", eps=1e-12):
    xf = x.astype(jnp.float32)
    if norm_mode == "rmsnorm":
        var = jnp.mean(xf * xf, axis=-1, keepdims=True)
        o = xf * jax.lax.rsqrt(var + eps)
    else:
        u = jnp.mean(xf, axis=-1, keepdims=True)
        s = jnp.mean((xf - u) ** 2, axis=-1, keepdims=True)
        o = (xf - u) / jnp.sqrt(s + eps)
    if cond is None:
        return weight * o + bias
    cond = cond.reshape(cond.shape[:-1] + (1,) * (x.ndim - cond.ndim)
                        + (cond.shape[-1],))
    g = weight + jnp.einsum("...c,hc->...h", cond, dense1_w)
    b = bias + jnp.einsum("...c,hc->...h", cond, dense2_w)
    return g * o + b


# ----------------------------- main -------------------------------------------

if __name__ == "__main__":
    key = jax.random.PRNGKey(0)
    batch, seq, hidden, cond_dim = 2, 8, 32, 16
    eps = 1e-12

    k1, k2, k3, k4 = jax.random.split(key, 4)
    x = jax.random.normal(k1, (batch, seq, hidden), dtype=jnp.float32)
    cond = jax.random.normal(k2, (batch, cond_dim), dtype=jnp.float32)

    # Parameters exactly as the module's __init__ initializes them.
    weight = jnp.ones((hidden,), dtype=jnp.float32)               # ones
    bias = jnp.zeros((hidden,), dtype=jnp.float32)                # zeros
    dense1_w0 = jnp.zeros((hidden, cond_dim), dtype=jnp.float32)  # uniform_(0,0)
    dense2_w0 = jnp.zeros((hidden, cond_dim), dtype=jnp.float32)  # uniform_(0,0)
    # Nonzero projection weights to actually exercise the conditional path.
    dense1_w = 0.1 * jax.random.normal(k3, (hidden, cond_dim), dtype=jnp.float32)
    dense2_w = 0.1 * jax.random.normal(k4, (hidden, cond_dim), dtype=jnp.float32)

    # 1) normal layernorm
    out = layer_norm(x, weight, bias, norm_mode="normal", eps=eps)
    jax.block_until_ready(out)
    ref = layer_norm_ref(x, weight, bias, norm_mode="normal", eps=eps)
    assert jnp.allclose(out, ref, atol=1e-5, rtol=1e-5)

    # 2) rmsnorm
    out_rms = layer_norm(x, weight, bias, norm_mode="rmsnorm", eps=eps)
    jax.block_until_ready(out_rms)
    ref_rms = layer_norm_ref(x, weight, bias, norm_mode="rmsnorm", eps=eps)
    assert jnp.allclose(out_rms, ref_rms, atol=1e-5, rtol=1e-5)

    # 3) conditional layernorm with module-init (zero) projection weights
    out_c0 = layer_norm(x, weight, bias, cond, dense1_w0, dense2_w0,
                        norm_mode="normal", eps=eps)
    jax.block_until_ready(out_c0)
    ref_c0 = layer_norm_ref(x, weight, bias, cond, dense1_w0, dense2_w0,
                            norm_mode="normal", eps=eps)
    assert jnp.allclose(out_c0, ref_c0, atol=1e-5, rtol=1e-5)

    # 4) conditional layernorm with nonzero projection weights
    out_c = layer_norm(x, weight, bias, cond, dense1_w, dense2_w,
                       norm_mode="normal", eps=eps)
    jax.block_until_ready(out_c)
    ref_c = layer_norm_ref(x, weight, bias, cond, dense1_w, dense2_w,
                           norm_mode="normal", eps=eps)
    assert jnp.allclose(out_c, ref_c, atol=1e-5, rtol=1e-5)

    # 5) ragged row counts (exercise the masked edge block), both paths
    x2 = jax.random.normal(k3, (3, 7, hidden), dtype=jnp.float32)
    cond2 = jax.random.normal(k4, (3, cond_dim), dtype=jnp.float32)
    out_r = layer_norm(x2, weight, bias, norm_mode="normal", eps=eps)
    jax.block_until_ready(out_r)
    assert jnp.allclose(
        out_r, layer_norm_ref(x2, weight, bias, norm_mode="normal", eps=eps),
        atol=1e-5, rtol=1e-5)
    out_rc = layer_norm(x2, weight, bias, cond2, dense1_w, dense2_w,
                        norm_mode="rmsnorm", eps=eps)
    jax.block_until_ready(out_rc)
    assert jnp.allclose(
        out_rc, layer_norm_ref(x2, weight, bias, cond2, dense1_w, dense2_w,
                               norm_mode="rmsnorm", eps=eps),
        atol=1e-5, rtol=1e-5)

    print("KERNEL_OK")
</pallas_src>

<mosaic_0001>
module attributes {stable_mosaic.version = 11 : i64} {
  func.func @_ln_kernel(%arg0: i32, %arg1: memref<8x32xf32, #tpu.memory_space<vmem>>, %arg2: memref<1x32xf32, #tpu.memory_space<vmem>>, %arg3: memref<1x32xf32, #tpu.memory_space<vmem>>, %arg4: memref<8x32xf32, #tpu.memory_space<vmem>>) attributes {dimension_semantics = [#tpu.dimension_semantics<parallel>], iteration_bounds = array<i64: 2>, scalar_prefetch = 0 : i64, scratch_operands = 0 : i64, tpu.core_type = #tpu.core_type<tc>, window_params = [{transform_indices = @transform_0, window_bounds = array<i64: 8, 32>}, {pipeline_mode = #tpu.pipeline_mode<synchronous>, transform_indices = @transform_1, window_bounds = array<i64: 1, 32>}, {pipeline_mode = #tpu.pipeline_mode<synchronous>, transform_indices = @transform_2, window_bounds = array<i64: 1, 32>}, {transform_indices = @transform_3, window_bounds = array<i64: 8, 32>}]} {
    %c0 = arith.constant 0 : index
    %c0_0 = arith.constant 0 : index
    %0 = vector.load %arg1[%c0, %c0_0] : memref<8x32xf32, #tpu.memory_space<vmem>>, vector<8x32xf32>
    %cst = arith.constant dense<0.000000e+00> : vector<8xf32>
    %1 = vector.multi_reduction <add>, %0, %cst [1] : vector<8x32xf32> to vector<8xf32>
    %2 = vector.shape_cast %1 : vector<8xf32> to vector<8x1xf32>
    %cst_1 = arith.constant 3.200000e+01 : f32
    %3 = vector.broadcast %cst_1 : f32 to vector<8x1xf32>
    %4 = arith.divf %2, %3 : vector<8x1xf32>
    %5 = arith.mulf %0, %0 : vector<8x32xf32>
    %cst_2 = arith.constant dense<0.000000e+00> : vector<8xf32>
    %6 = vector.multi_reduction <add>, %5, %cst_2 [1] : vector<8x32xf32> to vector<8xf32>
    %7 = vector.shape_cast %6 : vector<8xf32> to vector<8x1xf32>
    %cst_3 = arith.constant 3.200000e+01 : f32
    %8 = vector.broadcast %cst_3 : f32 to vector<8x1xf32>
    %9 = arith.divf %7, %8 : vector<8x1xf32>
    %10 = arith.mulf %4, %4 : vector<8x1xf32>
    %11 = arith.subf %9, %10 : vector<8x1xf32>
    %cst_4 = arith.constant 0.000000e+00 : f32
    %12 = vector.broadcast %cst_4 : f32 to vector<8x1xf32>
    %13 = arith.maximumf %11, %12 : vector<8x1xf32>
    %14 = vector.broadcast %4 : vector<8x1xf32> to vector<8x32xf32>
    %15 = arith.subf %0, %14 : vector<8x32xf32>
    %cst_5 = arith.constant 9.99999996E-13 : f32
    %16 = vector.broadcast %cst_5 : f32 to vector<8x1xf32>
    %17 = arith.addf %13, %16 : vector<8x1xf32>
    %18 = math.rsqrt %17 : vector<8x1xf32>
    %19 = vector.broadcast %18 : vector<8x1xf32> to vector<8x32xf32>
    %20 = arith.mulf %15, %19 : vector<8x32xf32>
    %c0_6 = arith.constant 0 : index
    %c0_7 = arith.constant 0 : index
    %21 = vector.load %arg2[%c0_6, %c0_7] : memref<1x32xf32, #tpu.memory_space<vmem>>, vector<1x32xf32>
    %22 = vector.broadcast %21 : vector<1x32xf32> to vector<8x32xf32>
    %23 = arith.mulf %22, %20 : vector<8x32xf32>
    %c0_8 = arith.constant 0 : index
    %c0_9 = arith.constant 0 : index
    %24 = vector.load %arg3[%c0_8, %c0_9] : memref<1x32xf32, #tpu.memory_space<vmem>>, vector<1x32xf32>
    %25 = vector.broadcast %24 : vector<1x32xf32> to vector<8x32xf32>
    %26 = arith.addf %23, %25 : vector<8x32xf32>
    %c0_10 = arith.constant 0 : index
    %c0_11 = arith.constant 0 : index
    %27 = vector.load %arg4[%c0_10, %c0_11] : memref<8x32xf32, #tpu.memory_space<vmem>>, vector<8x32xf32>
    tpu.vector_store %arg4[%c0_10, %c0_11], %26 {strides = array<i32>} : memref<8x32xf32, #tpu.memory_space<vmem>>, vector<8x32xf32>,
    return
  }
  func.func @transform_0(%arg0: i32) -> (i32, i32) {
    %c0_i32 = arith.constant 0 : i32
    %c0_i32_0 = arith.constant 0 : i32
    return %arg0, %c0_i32 : i32, i32
  }
  func.func @transform_1(%arg0: i32) -> (i32, i32) {
    %c0_i32 = arith.constant 0 : i32
    %c0_i32_0 = arith.constant 0 : i32
    %c0_i32_1 = arith.constant 0 : i32
    return %c0_i32, %c0_i32_0 : i32, i32
  }
  func.func @transform_2(%arg0: i32) -> (i32, i32) {
    %c0_i32 = arith.constant 0 : i32
    %c0_i32_0 = arith.constant 0 : i32
    %c0_i32_1 = arith.constant 0 : i32
    return %c0_i32, %c0_i32_0 : i32, i32
  }
  func.func @transform_3(%arg0: i32) -> (i32, i32) {
    %c0_i32 = arith.constant 0 : i32
    %c0_i32_0 = arith.constant 0 : i32
    return %arg0, %c0_i32 : i32, i32
  }
}

</mosaic_0001>

<bundles_post_ra>
// kernel: tpu_custom_call.1
= control target key start
LH: loop header
LB: loop body
LE: loop exit
PB: predicated region body
PF: predicated region fallthrough
CT: control target
= control target key end

     0   :  { %8 = vsyncpa [#allocation3], 0  ;;  %s634_s0 = inlined_call_operand.hbm [shape: f32[16,32], index: 0, kind: input, shape index: {}]   ;;  %s635_s1 = inlined_call_operand.vmem [shape: f32[1,32], index: 1, kind: input, shape index: {}]   ;;  %s636_s2 = inlined_call_operand.vmem [shape: f32[1,32], index: 2, kind: input, shape index: {}]   ;;  %s637_s3 = inlined_call_operand.hbm [shape: f32[16,32], index: 3, kind: output, shape index: {}]  }
   0x1   :  { %10 = vsyncpa [#allocation3 + $0x1], 0 }
   0x2   :  { %11 = vsyncpa [#allocation4], 0 }
   0x3   :  { %13 = vsyncpa [#allocation4 + $0x1], 0  ;;  %s484_s12 = smov 0   ;;  %s486_s13 = smov 0  }
   0x4   :  { %s488_s14 = smov 0   ;;  %s490_s15 = smov 0  }
   0x5 LB: > { %s505_s16 = sadd.s32 4294967295, %s460_s15   ;;  %s306_s17 = sadd.s32 4294967294, %s460_s15   ;;  %s460_s15 = sphi %s490_s15, %s654_s15   ;;  %s456_s14 = sphi %s488_s14, %s653_s14   ;;  %s452_s13 = sphi %s486_s13, %s652_s13   ;;  %s448_s12 = sphi %s484_s12, %s651_s12  }
   0x6   : > { %s509_s18 = sadd.s32 1, %s460_s15   ;;  %s26_s19 = sadd.s32 1, %s456_s14 }
   0x7   : > { %s23_s20 = ssub.s32 %s460_s15, %s509_s18  ;;  %p33_p0 = scmp.ne.s32.totalorder %s456_s14, %s452_s13 }
   0x8   : > { %p24_p1 = scmp.eq.s32.totalorder %s23_s20, 0  ;;  %p34_p2 = scmp.eq.s32.totalorder %s460_s15, 0 }
   0x9   : > { %p39_p3 = scmp.ne.s32.totalorder %s452_s13, %s448_s12  ;;  %p40_p4 = scmp.eq.s32.totalorder %s505_s16, 0 }
   0xa   : > { %s521_s21 = scalar_select %p24_p1, %s456_s14, %s26_s19  }
   0xb   : > { %p523_p5 = por %p34_p2, %p33_p0  ;;  %p527_p6 = por %p40_p4, %p39_p3 }
   0xc   : > { %p105_p7 = scmp.eq.s32.totalorder %s505_s16, 1  ;;  %p111_p8 = scmp.eq.s32.totalorder %s306_s17, 1 }
   0xd   : > { %s641_s23 = scalar_select %p527_p6, 1, 0 }
   0xe   : > { %p332_p10 = scmp.lt.s32.totalorder %s460_s15, 2  ;;  %p534_p11 = por %p105_p7, %p33_p0 }
   0xf   : > { %p538_p12 = por %p111_p8, %p39_p3  ;;  %s137_s26 = sand.u32 1, %s456_s14  }
  0x10   : > { %s642_s24 = scalar_select %p534_p11, 1, 0 }
  0x11   : > { %s643_s25 = scalar_select %p538_p12, 1, 0 }
  0x12   : > { %s310_s27 = sshll.u32 %s460_s15, 7  ;;  %s309_s28 = sshll.u32 %s137_s26, 3 }
  0x13   : > { %s547_s4 = scalar_lea.hbm %s634_s0, %s310_s27  ;;  %s141_s5 = scalar_lea.vmem [#allocation2], %s309_s28 }
  0x14   : > { %s148_s6 = sshll.u32 %s141_s5, 4  ;;  %p551_p13 = pnand %p332_p10, %p523_p5  ;;  %s555_s6 = int_to_ptr.vmem [resolvable:$true] %s148_s6 }
  0x15   : > { %s138_s8 = scalar_lea.sflag [#allocation3], %s137_s26  ;;  %s368_s9 = scalar_lea.hbm %s547_s4, 128 }
  0x16   : > { %p369_p2 = scmp.ne.s32.totalorder %s547_s4, %s368_s9  ;;  %p370_p3 = pneg %p551_p13 }
  0x17   : > { %s373_s17 = scalar_lea.hbm %s634_s0, 256  ;;  %p374_p5 = scmp.lt.s32.totalorder %s547_s4, %s634_s0 }
  0x18   : > { %p371_p4 = pnand %p370_p3, %p369_p2  ;;  %p375_p8 = scmp.lt.s32.totalorder %s373_s17, %s368_s9 }
  0x1a   : > { %p372_p7 = pneg %p371_p4  ;;  %p376_p10 = por %p375_p8, %p374_p5 }
  0x1c   : > { %p377_p9 = pnand %p376_p10, %p372_p7 }
  0x1e   : > { %380 = shalt.err (!%p377_p9)
}
  0x1f   : > { %s381_s22 = scalar_lea.vmem %s555_s6, 128  ;;  %s462_s26 = smov [#allocation2]  }
  0x20   : > { %p382_p0 = scmp.ne.s32.totalorder %s555_s6, %s381_s22  ;;  %s386_s27 = sshll.u32 %s462_s26, 4  ;;  %s387_s27 = int_to_ptr.vmem [resolvable:$false] %s386_s27 }
  0x21   : > { %s388_s28 = scalar_lea.vmem %s387_s27, 256  ;;  %p389_p4 = scmp.lt.s32.totalorder %s555_s6, %s387_s27 }
  0x22   : > { %p384_p1 = pnand %p382_p0, %p370_p3  ;;  %p390_p12 = scmp.lt.s32.totalorder %s388_s28, %s381_s22 }
  0x24   : > { %p385_p2 = pneg %p384_p1  ;;  %p391_p11 = por %p390_p12, %p389_p4 }
  0x26   : > { %p392_p6 = pnand %p391_p11, %p385_p2 }
  0x28   : > { %395 = shalt.err (!%p392_p6)
}
  0x29   : > { %327 = dma.hbm_to_vmem [thread:$0]  (!%p551_p13), %s547_s4, 128, %s555_s6, %s138_s8  }
  0x2a   : > { %p645_p9 = scmp.lt.s32.totalorder %s460_s15, 3  ;;  %p646_p7 = scmp.ge.s32.totalorder %s460_s15, 1 }
  0x2c   : > { %p154_p0 = pnand %p646_p7, %p645_p9 }
  0x2d   : > { %s582_s29 = sand.u32 (!%p154_p0), 1, %s452_s13   ;;  %p647_p6 = scmp.ne.s32.totalorder (!%p154_p0), %s641_s23, 0 }
  0x2e   : > { %157 = sbr.rel (%p154_p0) target bundleno = 237 (0xed), region = 32  ;;  %s312_s30 = sshll.u32 (!%p154_p0), %s582_s29, 3 }
  0x2f   : > { %s160_s5 = scalar_lea.sflag (!%p154_p0), [#allocation3], %s582_s29  ;;  %s163_s9 = scalar_lea.vmem (!%p154_p0), [#allocation2], %s312_s30 }
  0x33   : > { %439 = dma.done.wait (%p647_p6), %s160_s5, 128  }
  0x34   : > { %441 = vsyncadd (%p647_p6), %s160_s5, 4294967168  ;;  %vm187_vm0 = vcmask 261120   ;;  %v186_v0 = vld [vmem:[%s163_s9] sm:$0xff]  ;;  %s317_s8 = sshll.u32 %s505_s16, 7  ;;  %s185_s10 = scalar_lea.vmem [#allocation5], %s312_s30 }
  0x35   : > { %v188_v1 = vsel %vm187_vm0, %v186_v0, 0.0  ;;  %v193_v2 = vmul.f32 %v186_v0, %v186_v0  ;;  %v314_v14 = vld [vmem:[%s635_s1] ss:$0 sm:$0xff]  ;;  %s236_s11 = sshll.u32 %s185_s10, 4  ;;  %s234_s20 = scalar_lea.hbm %s637_s3, %s317_s8  ;;  %s237_s11 = int_to_ptr.vmem [resolvable:$true] %s236_s11 }
  0x36   : > { %189 = vadd.xlane.f32.xlu0 %v188_v1  ;;  %v315_v16 = vld [vmem:[%s636_s2] ss:$0 sm:$0xff]  ;;  %s223_s22 = scalar_lea.sflag [#allocation4], %s582_s29  ;;  %s396_s26 = scalar_lea.vmem %s237_s11, 128 }
  0x37   : > { %v194_v3 = vsel %vm187_vm0, %v193_v2, 0.0  ;;  %p397_p11 = scmp.ne.s32.totalorder %s237_s11, %s396_s26  ;;  %p648_p12 = scmp.ne.s32.totalorder %s642_s24, 0 }
  0x38   : > { %s463_s27 = smov [#allocation5]  }
  0x39   : > { %p398_p13 = pnand %p397_p11, %p648_p12  ;;  %s400_s28 = sshll.u32 %s463_s27, 4  ;;  %s401_s28 = int_to_ptr.vmem [resolvable:$false] %s400_s28 }
  0x3a   : > { %195 = vadd.xlane.f32.xlu0 %v194_v3  ;;  %s402_s16 = scalar_lea.vmem %s401_s28, 256  ;;  %p403_p3 = scmp.lt.s32.totalorder %s237_s11, %s401_s28 }
  0x3b   : > { %p399_p1 = pneg %p398_p13  ;;  %p404_p5 = scmp.lt.s32.totalorder %s402_s16, %s396_s26 }
  0x3d   : > { %p405_p8 = por %p404_p5, %p403_p3 }
  0x3f   : > { %p406_p10 = pnand %p405_p8, %p399_p1 }
  0xbf   : > { %v190_v4 = vpop.xlane.xlu0 %189 }
  0xc0   : > { %v192_v5 = vmul.f32 0.03125, %v190_v4 }
  0xc2   : > { %v198_v7 = vmul.f32 %v192_v5, %v192_v5  ;;  %v201_v12 = vsub.f32 %v186_v0, %v192_v5 }
  0xc3   : > { %v196_v6 = vpop.xlane.xlu0 %195 }
  0xc4   : > { %v197_v8 = vmul.f32 0.03125, %v196_v6 }
  0xc6   : > { %v199_v9 = vsub.f32 %v197_v8, %v198_v7 }
  0xc8   : > { %v200_v10 = vmax.f32 %v199_v9, 0.0 }
  0xca   : > { %v202_v11 = vadd.f32 1e-12, %v200_v10 }
  0xcc   : > { %366 = vrsqrt.f32 %v202_v11 }
  0xd9   : > { %v367_v13 = vpop.eup %366 }
  0xda   : > { %v204_v15 = vmul.f32 %v367_v13, %v201_v12 }
  0xdc   : > { %v212_v17 = vmul.f32 %v314_v14, %v204_v15 }
  0xde   : > { %v220_v18 = vadd.f32 %v315_v16, %v212_v17 }
  0xe0   : > { %221 = vst.msk [vmem:[%s185_s10] sm:$0xff] %vm187_vm0, %v220_v18 }
  0xe1   : > { %409 = shalt.err (!%p406_p10)
}
  0xe2   : > { %s410_s30 = scalar_lea.hbm %s234_s20, 128  ;;  %s414_s9 = scalar_lea.hbm %s637_s3, 256 }
  0xe3   : > { %p411_p2 = scmp.ne.s32.totalorder %s234_s20, %s410_s30  ;;  %p415_p7 = scmp.lt.s32.totalorder %s234_s20, %s637_s3 }
  0xe4   : > { %p416_p0 = scmp.lt.s32.totalorder %s414_s9, %s410_s30 }
  0xe5   : > { %p412_p4 = pnand %p411_p2, %p648_p12 }
  0xe6   : > { %p417_p6 = por %p416_p0, %p415_p7 }
  0xe7   : > { %p413_p9 = pneg %p412_p4 }
  0xe9   : > { %p418_p11 = pnand %p417_p6, %p413_p9 }
  0xeb   : > { %421 = shalt.err (!%p418_p11)
}
  0xec   : > { %322 = dma.vmem_to_hbm [thread:$0]  (%p648_p12), %s237_s11, 128, %s234_s20, %s223_s22  }
  0xed PF: > { %s248_s6 = sand.u32 1, %s448_s12   ;;  %p649_p13 = scmp.ne.s32.totalorder %s643_s25, 0 }
  0xee   : > { %p650_p1 = scmp.ge.s32.totalorder %s460_s15, 2  ;;  %s249_s7 = scalar_lea.sflag [#allocation4], %s248_s6 }
  0xf0   : > { %p329_p3 = pnand %p650_p1, %p649_p13 }
  0xf2   : > { %p330_p5 = pneg %p329_p3 }
  0xf4   : > { %443 = dma.done.wait (%p330_p5), %s249_s7, 128  }
  0xf5   : > { %445 = vsyncadd (%p330_p5), %s249_s7, 4294967168  ;;  %p16_p8 = scmp.ge.s32.totalorder %s509_s18, 4   ;;  %s651_s12 = smov %s452_s13 }
  0xf6   : > { %s652_s13 = smov %s456_s14  ;;  %s653_s14 = smov %s521_s21 }
  0xf7   : > { %s654_s15 = smov %s509_s18  ;;  %18 = sbr.rel (!%p16_p8) target bundleno = 5 (0x5), region = 77 }
  0xfc   :  { %254 = vsyncpa [#allocation3], 1 }
  0xfd   :  { %256 = vsyncpa [#allocation3 + $0x1], 1 }
  0xfe   :  { %257 = vsyncpa [#allocation4], 1 }
  0xff   :  { %259 = vsyncpa [#allocation4 + $0x1], 1 }

</bundles_post_ra>
